<compile_context>
chip_gen: v7x
topology: tpu7x:2x2x1
jax: 0.10.0
libtpu: 0.0.40
codegen_flags: <defaults>
</compile_context>

<pallas_src>
import functools

import jax
import jax.numpy as jnp
from jax import lax
from jax.experimental import pallas as pl
from jax.experimental.pallas import tpu as pltpu


def resblock_kernel(xt_ref, mask_ref, w3_ref, w1_ref, out_ref, col_ref,
                    *, W, T, halo_l, Cin):
    """One (batch, spatial-tile) pair per grid step.

    xt_ref:   (Cin, Lw)      conv-input window, Lw = halo_l + T + (W+1),
                             zero at image boundaries (compute dtype)
    mask_ref: (2, Lw)        row 0: 0 where the window element sits in image
                             column W-1 (kills wrap-around reads of dx==0 taps)
                             row 1: 0 where image column == 0 (dx==2 taps)
    w3_ref:   (Cout, 9*Cin)  conv3x3 weights, columns tap-major (tap = dy*3+dx)
    w1_ref:   (Cout, Cout)   conv1x1 weights
    out_ref:  (Cout, T)      output tile (input dtype)
    col_ref:  (9*Cin, T)     VMEM im2col scratch (compute dtype)
    """
    f32 = jnp.float32

    x_mid = xt_ref[...]                               # (Cin, Lw) window (bounded by T)
    # Column masking commutes with the channel contraction, so it is applied
    # once per dx-group on the window (2 multiplies) instead of once per tap.
    # (0/1 masks are exact in bf16; on v5e this multiply could be kept in f32.)
    x_l = x_mid * mask_ref[0:1, :]                    # source for dx == 0 taps
    x_r = x_mid * mask_ref[1:2, :]                    # source for dx == 2 taps

    # Build the (9*Cin, T) im2col block from 9 static lane-shifted slices.
    # Tap (dy, dx) at flat output position o reads x[h+dy-1, w+dx-1], i.e.
    # window position o_local + halo_l - (W+1) + dy*W + dx.
    base = halo_l - (W + 1)
    for dy in range(3):
        for dx in range(3):
            src = (x_l, x_mid, x_r)[dx]
            st = base + dy * W + dx
            t = dy * 3 + dx
            col_ref[t * Cin:(t + 1) * Cin, :] = src[:, st:st + T]

    # conv3x3 as ONE fused matmul (bf16/compute-dtype operands, f32 accumulate).
    acc = jnp.dot(w3_ref[...], col_ref[...], preferred_element_type=f32)
    h = jnp.maximum(acc, 0.0).astype(w1_ref.dtype)    # ReLU (f32) -> MXU operand dtype
    y = jnp.dot(w1_ref[...], h, preferred_element_type=f32)      # conv1x1

    x_res = x_mid[:, halo_l:halo_l + T].astype(f32)   # lane-aligned residual slice
    out_ref[...] = (x_res + y).astype(out_ref.dtype)


def residual_block_pallas(x_nchw, w3_oihw, w1_oihw, *, hw_tile=512,
                          compute_dtype=jnp.bfloat16):
    """x: (B, Cin, H, W); w3: (Cout, Cin, 3, 3); w1: (Cout, Cout, 1, 1).

    compute_dtype: dtype fed to the MXU (bf16 recommended on v6e/v7x); the
    accumulator, ReLU and residual add are always f32.  With bf16 the residual
    path adds a bf16-rounded x (compare with a loosened tolerance).
    """
    B, Cin, H, W = x_nchw.shape
    Cout = w3_oihw.shape[0]
    assert Cin == Cout, "residual add requires inputC == outputC"
    HW = H * W

    # Spatial lane-tile: a multiple of 128 that divides HW, else the whole image.
    if hw_tile is not None and HW % hw_tile == 0 and hw_tile % 128 == 0:
        T = hw_tile
    else:
        T = HW
    S = HW // T

    # Left halo rounded up to 128 lanes (lane-aligned residual slice inside the
    # window); right halo is the minimal W+1 needed by the bottom conv taps.
    halo_l = ((W + 1 + 127) // 128) * 128
    halo_r = W + 1
    Lw = T + halo_l + halo_r

    # Channel-major flattened-spatial layout, compute dtype, padded by
    # (halo_l, halo_r), then cut into S overlapping per-tile windows.
    x_flat = x_nchw.reshape(B, Cin, HW).astype(compute_dtype)
    xe = jnp.pad(x_flat, ((0, 0), (0, 0), (halo_l, halo_r)))
    xt = jnp.stack([xe[:, :, s * T:s * T + Lw] for s in range(S)], axis=1)  # (B,S,Cin,Lw)

    # Per-tile column masks over *read* positions (values 0/1, exact in bf16):
    #   row 0 zeroes image column W-1 (wrap-around reads of the dx==0 taps)
    #   row 1 zeroes image column 0   (wrap-around reads of the dx==2 taps)
    q = jnp.arange(Lw, dtype=jnp.int32)
    mask_rows = []
    for s in range(S):
        col = (s * T + q - halo_l) % W          # pad region is zero anyway
        mask_rows.append(jnp.stack([col != W - 1, col != 0], axis=0))
    masks = jnp.stack(mask_rows, axis=0).astype(compute_dtype)   # (S, 2, Lw)

    # Weights in fused-matmul form (columns grouped tap-major: tap = dy*3+dx).
    w3f = jnp.transpose(w3_oihw, (0, 2, 3, 1)).reshape(Cout, 9 * Cin)
    w3f = w3f.astype(compute_dtype)                              # (Cout, 9*Cin)
    w1m = w1_oihw[:, :, 0, 0].astype(compute_dtype)              # (Cout, Cout)

    kernel = functools.partial(resblock_kernel, W=W, T=T, halo_l=halo_l, Cin=Cin)

    out_flat = pl.pallas_call(
        kernel,
        out_shape=jax.ShapeDtypeStruct((B, Cout, HW), x_nchw.dtype),
        grid=(B, S),
        in_specs=[
            pl.BlockSpec((None, None, Cin, Lw), lambda b, s: (b, s, 0, 0)),
            pl.BlockSpec((None, 2, Lw), lambda b, s: (s, 0, 0)),
            # Constant index maps -> fetched once, stay resident across steps.
            # (pipeline_mode=pl.Buffered(1) would drop their 2nd buffer; left
            #  at the default since they are tiny vs the VMEM budget here.)
            pl.BlockSpec((Cout, 9 * Cin), lambda b, s: (0, 0)),
            pl.BlockSpec((Cout, Cout), lambda b, s: (0, 0)),
        ],
        out_specs=pl.BlockSpec((None, Cout, T), lambda b, s: (b, 0, s)),
        scratch_shapes=[pltpu.VMEM((9 * Cin, T), compute_dtype)],
        compiler_params=pltpu.CompilerParams(
            # Both grid axes are independent -> v7x's two TensorCores split the
            # B*S steps evenly; single-core chips just pipeline deeper.
            dimension_semantics=("parallel", "parallel"),
            # Per-step footprint at realistic VQVAE shapes (C=256, T=512, bf16):
            # ~0.4 MB x2 input window, ~0.5 MB x2 f32 output, ~1.2 MB w3,
            # ~2.4 MB im2col scratch + a few MB temporaries -> well under the
            # 48 MiB budget (fits v7x's 64 MiB physical VMEM with headroom).
            vmem_limit_bytes=48 * 1024 * 1024,
        ),
    )(xt, masks, w3f, w1m)

    return out_flat.reshape(B, Cout, H, W)


def residual_block_ref(x_nchw, w3_oihw, w1_oihw):
    """Pure-JAX reference matching the PyTorch module (NCHW convs)."""
    dn = ("NCHW", "OIHW", "NCHW")
    h = lax.conv_general_dilated(x_nchw, w3_oihw, (1, 1), "SAME", dimension_numbers=dn)
    h = jnp.maximum(h, 0.0)
    y = lax.conv_general_dilated(h, w1_oihw, (1, 1), "VALID", dimension_numbers=dn)
    return x_nchw + y


if __name__ == "__main__":
    key = jax.random.PRNGKey(0)

    def make_inputs(k, B, C, H, W):
        kx, k3, k1 = jax.random.split(k, 3)
        x = jax.random.normal(kx, (B, C, H, W), dtype=jnp.float32)
        w3 = 0.1 * jax.random.normal(k3, (C, C, 3, 3), dtype=jnp.float32)
        w1 = 0.1 * jax.random.normal(k1, (C, C, 1, 1), dtype=jnp.float32)
        return x, w3, w1

    # Config 1: small spec shape (single spatial tile).
    # Config 2: exercises the (B, S) spatial grid and cross-tile halo handling.
    configs = [((2, 4, 16, 16), 512), ((2, 8, 32, 32), 512)]
    keys = jax.random.split(key, len(configs))
    for (shape, tile), kk in zip(configs, keys):
        B, C, H, W = shape
        x, w3, w1 = make_inputs(kk, B, C, H, W)
        ref = residual_block_ref(x, w3, w1)

        # Exact path (f32 MXU operands): validates pad/mask/halo arithmetic.
        out_f32 = jax.block_until_ready(
            residual_block_pallas(x, w3, w1, hw_tile=tile,
                                  compute_dtype=jnp.float32))
        assert out_f32.shape == x.shape
        assert jnp.allclose(out_f32, ref, atol=1e-4, rtol=1e-4), "f32 mismatch"

        # Production path (bf16 MXU operands, f32 accumulation): bf16-rounded
        # operands + residual -> loosened tolerance vs the f32 reference.
        out_bf16 = jax.block_until_ready(
            residual_block_pallas(x, w3, w1, hw_tile=tile,
                                  compute_dtype=jnp.bfloat16))
        assert jnp.allclose(out_bf16, ref, atol=5e-2, rtol=5e-2), "bf16 mismatch"

    print("KERNEL_OK")
</pallas_src>

<mosaic_0001>
module attributes {stable_mosaic.version = 11 : i64} {
  func.func @resblock_kernel(%arg0: i32, %arg1: i32, %arg2: memref<1x1x4x401xf32, #tpu.memory_space<vmem>>, %arg3: memref<1x2x401xf32, #tpu.memory_space<vmem>>, %arg4: memref<4x36xf32, #tpu.memory_space<vmem>>, %arg5: memref<4x4xf32, #tpu.memory_space<vmem>>, %arg6: memref<1x4x256xf32, #tpu.memory_space<vmem>>, %arg7: memref<36x256xf32, #tpu.memory_space<vmem>>) attributes {dimension_semantics = [#tpu.dimension_semantics<parallel>, #tpu.dimension_semantics<parallel>], iteration_bounds = array<i64: 2, 1>, scalar_prefetch = 0 : i64, scratch_operands = 1 : i64, tpu.core_type = #tpu.core_type<tc>, window_params = [{transform_indices = @transform_0, window_bounds = array<i64: 1, 1, 4, 401>}, {transform_indices = @transform_1, window_bounds = array<i64: 1, 2, 401>}, {pipeline_mode = #tpu.pipeline_mode<synchronous>, transform_indices = @transform_2, window_bounds = array<i64: 4, 36>}, {pipeline_mode = #tpu.pipeline_mode<synchronous>, transform_indices = @transform_3, window_bounds = array<i64: 4, 4>}, {transform_indices = @transform_4, window_bounds = array<i64: 1, 4, 256>}]} {
    %c0 = arith.constant 0 : index
    %c0_0 = arith.constant 0 : index
    %c0_1 = arith.constant 0 : index
    %c0_2 = arith.constant 0 : index
    %0 = vector.load %arg2[%c0, %c0_0, %c0_1, %c0_2] : memref<1x1x4x401xf32, #tpu.memory_space<vmem>>, vector<1x1x4x401xf32>
    %1 = vector.shape_cast %0 : vector<1x1x4x401xf32> to vector<4x401xf32>
    %c0_3 = arith.constant 0 : index
    %c0_4 = arith.constant 0 : index
    %c0_5 = arith.constant 0 : index
    %2 = vector.load %arg3[%c0_3, %c0_4, %c0_5] : memref<1x2x401xf32, #tpu.memory_space<vmem>>, vector<1x1x401xf32>
    %3 = vector.shape_cast %2 : vector<1x1x401xf32> to vector<1x401xf32>
    %4 = vector.broadcast %3 : vector<1x401xf32> to vector<4x401xf32>
    %5 = arith.mulf %1, %4 : vector<4x401xf32>
    %c0_6 = arith.constant 0 : index
    %c1 = arith.constant 1 : index
    %c0_7 = arith.constant 0 : index
    %6 = vector.load %arg3[%c0_6, %c1, %c0_7] : memref<1x2x401xf32, #tpu.memory_space<vmem>>, vector<1x1x401xf32>
    %7 = vector.shape_cast %6 : vector<1x1x401xf32> to vector<1x401xf32>
    %8 = vector.broadcast %7 : vector<1x401xf32> to vector<4x401xf32>
    %9 = arith.mulf %1, %8 : vector<4x401xf32>
    %10 = vector.extract_strided_slice %5 {offsets = [0, 111], sizes = [4, 256], strides = [1, 1]} : vector<4x401xf32> to vector<4x256xf32>
    %c0_8 = arith.constant 0 : index
    %c0_9 = arith.constant 0 : index
    %11 = vector.load %arg7[%c0_8, %c0_9] : memref<36x256xf32, #tpu.memory_space<vmem>>, vector<4x256xf32>
    tpu.vector_store %arg7[%c0_8, %c0_9], %10 {strides = array<i32>} : memref<36x256xf32, #tpu.memory_space<vmem>>, vector<4x256xf32>,
    %12 = vector.extract_strided_slice %1 {offsets = [0, 112], sizes = [4, 256], strides = [1, 1]} : vector<4x401xf32> to vector<4x256xf32>
    %c4 = arith.constant 4 : index
    %c0_10 = arith.constant 0 : index
    %13 = vector.load %arg7[%c4, %c0_10] : memref<36x256xf32, #tpu.memory_space<vmem>>, vector<4x256xf32>
    tpu.vector_store %arg7[%c4, %c0_10], %12 {strides = array<i32>} : memref<36x256xf32, #tpu.memory_space<vmem>>, vector<4x256xf32>,
    %14 = vector.extract_strided_slice %9 {offsets = [0, 113], sizes = [4, 256], strides = [1, 1]} : vector<4x401xf32> to vector<4x256xf32>
    %c8 = arith.constant 8 : index
    %c0_11 = arith.constant 0 : index
    %15 = vector.load %arg7[%c8, %c0_11] : memref<36x256xf32, #tpu.memory_space<vmem>>, vector<4x256xf32>
    tpu.vector_store %arg7[%c8, %c0_11], %14 {strides = array<i32>} : memref<36x256xf32, #tpu.memory_space<vmem>>, vector<4x256xf32>,
    %16 = vector.extract_strided_slice %5 {offsets = [0, 127], sizes = [4, 256], strides = [1, 1]} : vector<4x401xf32> to vector<4x256xf32>
    %c12 = arith.constant 12 : index
    %c0_12 = arith.constant 0 : index
    %17 = vector.load %arg7[%c12, %c0_12] : memref<36x256xf32, #tpu.memory_space<vmem>>, vector<4x256xf32>
    tpu.vector_store %arg7[%c12, %c0_12], %16 {strides = array<i32>} : memref<36x256xf32, #tpu.memory_space<vmem>>, vector<4x256xf32>,
    %18 = vector.extract_strided_slice %1 {offsets = [0, 128], sizes = [4, 256], strides = [1, 1]} : vector<4x401xf32> to vector<4x256xf32>
    %c16 = arith.constant 16 : index
    %c0_13 = arith.constant 0 : index
    %19 = vector.load %arg7[%c16, %c0_13] : memref<36x256xf32, #tpu.memory_space<vmem>>, vector<4x256xf32>
    tpu.vector_store %arg7[%c16, %c0_13], %18 {strides = array<i32>} : memref<36x256xf32, #tpu.memory_space<vmem>>, vector<4x256xf32>,
    %20 = vector.extract_strided_slice %9 {offsets = [0, 129], sizes = [4, 256], strides = [1, 1]} : vector<4x401xf32> to vector<4x256xf32>
    %c20 = arith.constant 20 : index
    %c0_14 = arith.constant 0 : index
    %21 = vector.load %arg7[%c20, %c0_14] : memref<36x256xf32, #tpu.memory_space<vmem>>, vector<4x256xf32>
    tpu.vector_store %arg7[%c20, %c0_14], %20 {strides = array<i32>} : memref<36x256xf32, #tpu.memory_space<vmem>>, vector<4x256xf32>,
    %22 = vector.extract_strided_slice %5 {offsets = [0, 143], sizes = [4, 256], strides = [1, 1]} : vector<4x401xf32> to vector<4x256xf32>
    %c24 = arith.constant 24 : index
    %c0_15 = arith.constant 0 : index
    %23 = vector.load %arg7[%c24, %c0_15] : memref<36x256xf32, #tpu.memory_space<vmem>>, vector<4x256xf32>
    tpu.vector_store %arg7[%c24, %c0_15], %22 {strides = array<i32>} : memref<36x256xf32, #tpu.memory_space<vmem>>, vector<4x256xf32>,
    %24 = vector.extract_strided_slice %1 {offsets = [0, 144], sizes = [4, 256], strides = [1, 1]} : vector<4x401xf32> to vector<4x256xf32>
    %c28 = arith.constant 28 : index
    %c0_16 = arith.constant 0 : index
    %25 = vector.load %arg7[%c28, %c0_16] : memref<36x256xf32, #tpu.memory_space<vmem>>, vector<4x256xf32>
    tpu.vector_store %arg7[%c28, %c0_16], %24 {strides = array<i32>} : memref<36x256xf32, #tpu.memory_space<vmem>>, vector<4x256xf32>,
    %26 = vector.extract_strided_slice %9 {offsets = [0, 145], sizes = [4, 256], strides = [1, 1]} : vector<4x401xf32> to vector<4x256xf32>
    %c32 = arith.constant 32 : index
    %c0_17 = arith.constant 0 : index
    %27 = vector.load %arg7[%c32, %c0_17] : memref<36x256xf32, #tpu.memory_space<vmem>>, vector<4x256xf32>
    tpu.vector_store %arg7[%c32, %c0_17], %26 {strides = array<i32>} : memref<36x256xf32, #tpu.memory_space<vmem>>, vector<4x256xf32>,
    %c0_18 = arith.constant 0 : index
    %c0_19 = arith.constant 0 : index
    %28 = vector.load %arg4[%c0_18, %c0_19] : memref<4x36xf32, #tpu.memory_space<vmem>>, vector<4x36xf32>
    %c0_20 = arith.constant 0 : index
    %c0_21 = arith.constant 0 : index
    %29 = vector.load %arg7[%c0_20, %c0_21] : memref<36x256xf32, #tpu.memory_space<vmem>>, vector<36x256xf32>
    %cst = arith.constant dense<0.000000e+00> : vector<4x256xf32>
    %30 = tpu.matmul %28, %29, %cst {dimension_numbers = #tpu.dot_dimension_numbers<[1], [0], [0], [1], [0, 0, 1, 1], [], []>} : vector<4x36xf32>, vector<36x256xf32>, vector<4x256xf32> -> vector<4x256xf32>
    %cst_22 = arith.constant 0.000000e+00 : f32
    %31 = vector.broadcast %cst_22 : f32 to vector<4x256xf32>
    %32 = arith.maximumf %30, %31 : vector<4x256xf32>
    %c0_23 = arith.constant 0 : index
    %c0_24 = arith.constant 0 : index
    %33 = vector.load %arg5[%c0_23, %c0_24] : memref<4x4xf32, #tpu.memory_space<vmem>>, vector<4x4xf32>
    %cst_25 = arith.constant dense<0.000000e+00> : vector<4x256xf32>
    %34 = tpu.matmul %33, %32, %cst_25 {dimension_numbers = #tpu.dot_dimension_numbers<[1], [0], [0], [1], [0, 0, 1, 1], [], []>} : vector<4x4xf32>, vector<4x256xf32>, vector<4x256xf32> -> vector<4x256xf32>
    %35 = vector.extract_strided_slice %1 {offsets = [0, 128], sizes = [4, 256], strides = [1, 1]} : vector<4x401xf32> to vector<4x256xf32>
    %36 = arith.addf %35, %34 : vector<4x256xf32>
    %c0_26 = arith.constant 0 : index
    %c0_27 = arith.constant 0 : index
    %c0_28 = arith.constant 0 : index
    %37 = vector.load %arg6[%c0_26, %c0_27, %c0_28] : memref<1x4x256xf32, #tpu.memory_space<vmem>>, vector<1x4x256xf32>
    %38 = vector.shape_cast %37 : vector<1x4x256xf32> to vector<4x256xf32>
    %39 = vector.shape_cast %36 : vector<4x256xf32> to vector<1x4x256xf32>
    tpu.vector_store %arg6[%c0_26, %c0_27, %c0_28], %39 {strides = array<i32>} : memref<1x4x256xf32, #tpu.memory_space<vmem>>, vector<1x4x256xf32>,
    return
  }
  func.func @transform_0(%arg0: i32, %arg1: i32) -> (i32, i32, i32, i32) {
    %c0_i32 = arith.constant 0 : i32
    %c0_i32_0 = arith.constant 0 : i32
    %c0_i32_1 = arith.constant 0 : i32
    return %arg0, %arg1, %c0_i32, %c0_i32_0 : i32, i32, i32, i32
  }
  func.func @transform_1(%arg0: i32, %arg1: i32) -> (i32, i32, i32) {
    %c0_i32 = arith.constant 0 : i32
    %c0_i32_0 = arith.constant 0 : i32
    %c0_i32_1 = arith.constant 0 : i32
    return %arg1, %c0_i32, %c0_i32_0 : i32, i32, i32
  }
  func.func @transform_2(%arg0: i32, %arg1: i32) -> (i32, i32) {
    %c0_i32 = arith.constant 0 : i32
    %c0_i32_0 = arith.constant 0 : i32
    %c0_i32_1 = arith.constant 0 : i32
    return %c0_i32, %c0_i32_0 : i32, i32
  }
  func.func @transform_3(%arg0: i32, %arg1: i32) -> (i32, i32) {
    %c0_i32 = arith.constant 0 : i32
    %c0_i32_0 = arith.constant 0 : i32
    %c0_i32_1 = arith.constant 0 : i32
    return %c0_i32, %c0_i32_0 : i32, i32
  }
  func.func @transform_4(%arg0: i32, %arg1: i32) -> (i32, i32, i32) {
    %c0_i32 = arith.constant 0 : i32
    %c0_i32_0 = arith.constant 0 : i32
    return %arg0, %c0_i32, %arg1 : i32, i32, i32
  }
}

</mosaic_0001>

<bundles_post_ra>
// kernel: tpu_custom_call.1
= control target key start
LH: loop header
LB: loop body
LE: loop exit
PB: predicated region body
PF: predicated region fallthrough
CT: control target
= control target key end

     0   :  { %9 = vsyncpa [#allocation4], 0  ;;  %s1281_s0 = inlined_call_operand.hbm [shape: f32[2,1,4,401], index: 0, kind: input, shape index: {}]   ;;  %s1282_s1 = inlined_call_operand.hbm [shape: f32[1,2,401], index: 1, kind: input, shape index: {}]   ;;  %s1283_s2 = inlined_call_operand.vmem [shape: f32[4,36], index: 2, kind: input, shape index: {}]   ;;  %s1284_s3 = inlined_call_operand.vmem [shape: f32[4,4], index: 3, kind: input, shape index: {}]   ;;  %s1285_s4 = inlined_call_operand.hbm [shape: f32[2,4,256], index: 4, kind: output, shape index: {}]  }
   0x1   :  { %11 = vsyncpa [#allocation4 + $0x1], 0 }
   0x2   :  { %12 = vsyncpa [#allocation7], 0 }
   0x3   :  { %13 = vsyncpa [#allocation5], 0 }
   0x4   :  { %15 = vsyncpa [#allocation5 + $0x1], 0  ;;  %s1029_s15 = smov 0   ;;  %s1031_s16 = smov 0  }
   0x5   :  { %s1033_s17 = smov 0   ;;  %s1035_s18 = smov 0  }
   0x6   :  { %s1037_s19 = smov 0   ;;  %s1039_s20 = smov 0  }
   0x7 LB: > { %s728_s21 = sadd.s32 4294967295, %s990_s20   ;;  %s729_s22 = sadd.s32 4294967294, %s990_s20   ;;  %s990_s20 = sphi %s1039_s20, %s21_s20   ;;  %s986_s19 = sphi %s1037_s19, %s1310_s19   ;;  %s982_s18 = sphi %s1035_s18, %s1309_s18   ;;  %s978_s17 = sphi %s1033_s17, %s1308_s17   ;;  %s974_s16 = sphi %s1031_s16, %s1307_s16   ;;  %s970_s15 = sphi %s1029_s15, %s1306_s15  }
   0x8   : > { %p55_p0 = scmp.ne.s32.totalorder %s974_s16, %s970_s15  ;;  %p1063_p1 = scmp.eq.s32.totalorder %s728_s21, 0 }
   0x9   : > { %p1067_p2 = scmp.eq.s32.totalorder %s728_s21, 1  ;;  %p155_p3 = scmp.eq.s32.totalorder %s729_s22, 1 }
   0xa   : > { %s1290_s23 = scalar_select %p1063_p1, 1, 0 }
   0xb   : > { %s1291_s24 = scalar_select %p1067_p2, 1, 0 }
   0xc   : > { %p1073_p4 = por %p1063_p1, %p55_p0  ;;  %p730_p5 = scmp.ge.s32.totalorder %s990_s20, 1 }
   0xd   : > { %p1078_p6 = por %p155_p3, %p55_p0  ;;  %p162_p7 = scmp.lt.s32.totalorder %s990_s20, 3 }
   0xe   : > { %s1292_s25 = scalar_select %p1073_p4, 1, 0 }
   0xf   : > { %s1293_s26 = scalar_select %p1078_p6, 1, 0 }
  0x10   : > { %p1083_p8 = pnand %p730_p5, %p162_p7  ;;  %s992_s28 = smov [#allocation6]  }
  0x11   : > { %s178_s29 = sshll.u32 %s992_s28, 4  ;;  %s33_s5 = sadd.s32 1, %s986_s19  ;;  %s179_s29 = int_to_ptr.vmem [resolvable:$true] %s178_s29 }
  0x12   : > { %s1294_s27 = scalar_select %p1083_p8, 1, 0 }
  0x13   : > { %p769_p10 = pneg %p1083_p8  ;;  %s42_s6 = sadd.s32 1, %s978_s17 }
  0x14   : > { %p1098_p12 = scmp.ge.s32.totalorder %s33_s5, 2  ;;  %s846_s10 = scalar_lea.hbm %s1282_s1, 128 }
  0x15   : > { %p1092_p11 = pnand %p769_p10, %p1063_p1  ;;  %p847_p13 = scmp.ne.s32.totalorder %s1282_s1, %s846_s10 }
  0x16   : > { %s1296_s7 = scalar_select %p1098_p12, 1, 0 }
  0x17   : > { %p848_p0 = pneg %p1092_p11  ;;  %p853_p7 = scmp.lt.u32.totalorder %s846_s10, %s1282_s1 }
  0x19   : > { %p849_p3 = pnand %p848_p0, %p847_p13 }
  0x1b   : > { %p850_p5 = pneg %p849_p3 }
  0x1d   : > { %p855_p10 = pnand %p853_p7, %p850_p5 }
  0x1f   : > { %858 = shalt.err (!%p855_p10)
}
  0x20   : > { %s859_s21 = scalar_lea.vmem %s179_s29, 128  ;;  %p867_p4 = scmp.lt.s32.totalorder %s179_s29, %s179_s29 }
  0x21   : > { %p860_p9 = scmp.ne.s32.totalorder %s179_s29, %s859_s21  ;;  %p868_p8 = scmp.lt.s32.totalorder %s859_s21, %s859_s21 }
  0x23   : > { %p862_p6 = pnand %p860_p9, %p848_p0  ;;  %p869_p2 = por %p868_p8, %p867_p4 }
  0x25   : > { %p863_p1 = pneg %p862_p6 }
  0x27   : > { %p870_p12 = pnand %p869_p2, %p863_p1 }
  0x29   : > { %873 = shalt.err (!%p870_p12)
}
  0x2a   : > { %772 = dma.hbm_to_vmem [thread:$0]  (!%p1092_p11), %s1282_s1, 128, %s179_s29, [#allocation7]  }
  0x2b   : > { %p1297_p4 = scmp.ne.s32.totalorder %s1296_s7, 0  ;;  %p49_p1 = scmp.ne.s32.totalorder %s978_s17, %s974_s16 }
  0x2c   : > { %p50_p2 = scmp.eq.s32.totalorder %s990_s20, 0  ;;  %p782_p6 = scmp.lt.s32.totalorder %s990_s20, 2 }
  0x2d   : > { %s1312_s5 = smov (%p1297_p4, %s33_s5), 0  ;;  %p1298_p12 = scmp.ne.s32.totalorder %s1291_s24, 0 }
  0x2e   : > { %s37_s30 = ssub.s32 %s986_s19, %s1312_s5  ;;  %p51_p9 = por %p50_p2, %p49_p1 }
  0x2f   : > { %p40_p8 = scmp.eq.s32.totalorder %s37_s30, 0  ;;  %p1130_p13 = por %p1298_p12, %p49_p1 }
  0x30   : > { %s195_s9 = sand.u32 1, %s978_s17   ;;  %s751_s7 = sshll.u32 %s986_s19, 8 }
  0x31   : > { %s1138_s10 = scalar_select %p40_p8, %s978_s17, %s42_s6  }
  0x32   : > { %s733_s29 = sshll.u32 %s195_s9, 4  ;;  %s1144_s13 = scalar_lea.hbm %s1281_s0, %s751_s7 }
  0x33   : > { %s199_s24 = scalar_lea.vmem [#allocation3], %s733_s29  ;;  %p1148_p11 = pnand %p782_p6, %p51_p9 }
  0x34   : > { %s209_s14 = sshll.u32 %s199_s24, 4  ;;  %s196_s6 = scalar_lea.sflag [#allocation4], %s195_s9  ;;  %s1146_s14 = int_to_ptr.vmem [resolvable:$true] %s209_s14 }
  0x35   : > { %s874_s22 = scalar_lea.hbm %s1144_s13, 256  ;;  %p876_p3 = pneg %p1148_p11 }
  0x36   : > { %p875_p0 = scmp.ne.s32.totalorder %s1144_s13, %s874_s22  ;;  %s879_s29 = scalar_lea.hbm %s1281_s0, 512 }
  0x37   : > { %p880_p10 = scmp.lt.u32.totalorder %s1144_s13, %s1281_s0  ;;  %p881_p4 = scmp.lt.u32.totalorder %s879_s29, %s874_s22 }
  0x38   : > { %p877_p5 = pnand %p876_p3, %p875_p0  ;;  %p883_p2 = scmp.lt.u32.totalorder %s874_s22, %s1144_s13 }
  0x39   : > { %p882_p1 = por %p881_p4, %p880_p10 }
  0x3a   : > { %p878_p7 = pneg %p877_p5 }
  0x3b   : > { %p884_p6 = por %p883_p2, %p882_p1 }
  0x3d   : > { %p885_p8 = pnand %p884_p6, %p878_p7 }
  0x3f   : > { %888 = shalt.err (!%p885_p8)
}
  0x40   : > { %s889_s9 = scalar_lea.vmem %s1146_s14, 256  ;;  %s993_s12 = smov [#allocation3]  }
  0x41   : > { %p890_p9 = scmp.ne.s32.totalorder %s1146_s14, %s889_s9  ;;  %s894_s24 = sshll.u32 %s993_s12, 4  ;;  %s895_s24 = int_to_ptr.vmem [resolvable:$false] %s894_s24 }
  0x42   : > { %s896_s28 = scalar_lea.vmem %s895_s24, 512  ;;  %p897_p5 = scmp.lt.s32.totalorder %s1146_s14, %s895_s24 }
  0x43   : > { %p892_p12 = pnand %p890_p9, %p876_p3  ;;  %p898_p10 = scmp.lt.s32.totalorder %s896_s28, %s889_s9 }
  0x45   : > { %p893_p0 = pneg %p892_p12  ;;  %p899_p4 = por %p898_p10, %p897_p5 }
  0x47   : > { %p900_p1 = pnand %p899_p4, %p893_p0 }
  0x49   : > { %903 = shalt.err (!%p900_p1)
}
  0x4a   : > { %776 = dma.hbm_to_vmem [thread:$0]  (!%p1148_p11), %s1144_s13, 256, %s1146_s14, %s196_s6  }
  0x4b   : > { %p1301_p7 = scmp.ne.s32.totalorder %s1294_s27, 0 }
  0x4c   : > { %s1180_s22 = sand.u32 (!%p1301_p7), 1, %s974_s16   ;;  %p1302_p3 = scmp.ne.s32.totalorder (!%p1301_p7), %s1292_s25, 0 }
  0x4d   : > { %218 = sbr.rel (%p1301_p7) target bundleno = 719 (0x2cf), region = 36  ;;  %s737_s30 = sshll.u32 (!%p1301_p7), %s1180_s22, 4 }
  0x4e   : > { %s221_s29 = scalar_lea.sflag (!%p1301_p7), [#allocation4], %s1180_s22  ;;  %s224_s7 = scalar_lea.vmem (!%p1301_p7), [#allocation3], %s737_s30 }
  0x54   : > { %957 = dma.done.wait (%p1302_p3), %s221_s29, 256  }
  0x55   : > { %959 = vsyncadd (%p1302_p3), %s221_s29, 4294967040  ;;  %p1303_p2 = scmp.ne.s32.totalorder %s1290_s23, 0 }
  0x57   : > { %961 = dma.done.wait (%p1303_p2), [#allocation7], 128  }
  0x58   : > { %963 = vsyncadd (%p1303_p2), [#allocation7], 4294967168  ;;  %v258_v0 = vlaneseq  ;;  %v1192_v6 = vld [vmem:[%s224_s7] sm:$0xff]  ;;  %v1194_v7 = vld [vmem:[%s224_s7 + $0x8] sm:$0xff]  ;;  %s994_s27 = smov 16   ;;  %s995_s23 = smov 17  }
  0x59   : > { %v256_v8 = vld [vmem:[#allocation6] ss:$2 sm:$0xf]  ;;  %327 = vrot.lane.b32.xlu1 %v1192_v6, %s994_s27  ;;  %v369_v9 = vcombine.high %v1192_v6, %v1192_v6  ;;  %v324_v10 = vcombine.low %v1194_v7, %v1194_v7  ;;  %372 = vst [vmem:[#allocation2 + $0x28] sm:$0xf] %v1194_v7  ;;  %v323_v20 = vcombine.low %v1192_v6, %v1192_v6  ;;  %s996_s25 = smov 1  }
  0x5a   : > { %v259_v1 = vshrl.u32 %v258_v0, 7  ;;  %v281_v13 = vld [vmem:[#allocation6 + $0x1] ss:$2 sm:$0xf]  ;;  %s997_s13 = smov 15   ;;  %s998_s14 = smov 127  }
  0x5b   : > { %371 = vst [vmem:[#allocation2 + $0x20] sm:$0xf] %v369_v9  ;;  %s999_s21 = smov 113   ;;  %s1000_s6 = smov 112   ;;  %v1002_v36 = vmov 0.0   ;;  %vm331_vm0 = vcmask 130048  }
  0x5c   : > { %v268_v2 = vsub.s32 2, %v259_v1  ;;  %v272_v3 = vsub.s32 3, %v259_v1  ;;  %v260_v4 = vsub.s32 0, %v259_v1  ;;  %v264_v5 = vsub.s32 1, %v259_v1  ;;  %s1001_s11 = smov 111   ;;  %514 = vmatprep.mubr.f32.mxu0 %v1002_v36  ;;  %598 = vmatprep.mubr.f32.mxu1 %v1002_v36  ;;  %s739_s30 = sshll.u32 %s1180_s22, 3 }
  0x5d   : > { %329 = vrot.lane.b32.xlu1 %v324_v10, %s994_s27  ;;  %vm362_vm1 = vcmask 7168   ;;  %vm314_vm2 = vcmask 138240   ;;  %vm347_vm3 = vcmask 121856   ;;  %vm380_vm4 = vcmask 1039360   ;;  %s752_s29 = sshll.u32 %s982_s18, 7  ;;  %s252_s7 = scalar_lea.vmem [#allocation8], %s739_s30 }
  0x5e   : > { %v269_v11 = vrot.slane %v256_v8, %v268_v2  ;;  %v273_v12 = vrot.slane %v256_v8, %v272_v3  ;;  %v294_v14 = vrot.slane %v281_v13, %v268_v2  ;;  %v298_v15 = vrot.slane %v281_v13, %v272_v3  ;;  %s1003_s18 = smov [#allocation8]  }
  0x5f   : > { %v261_v16 = vrot.slane %v256_v8, %v260_v4  ;;  %v265_v18 = vrot.slane %v256_v8, %v264_v5  ;;  %v286_v24 = vrot.slane %v281_v13, %v260_v4  ;;  %v290_v25 = vrot.slane %v281_v13, %v264_v5 }
  0x60   : > { %v275_v17 = vcombine.low %v269_v11, %v273_v12  ;;  %v300_v22 = vcombine.low %v294_v14, %v298_v15  ;;  %vm394_vm5 = vcmask 924672   ;;  %vm407_vm6 = vcmask 916480  }
  0x61   : > { %v274_v21 = vcombine.low %v261_v16, %v265_v18  ;;  %325 = vrot.lane.b32.xlu1 %v323_v20, %s994_s27  ;;  %v299_v27 = vcombine.low %v286_v24, %v290_v25  ;;  %vm421_vm7 = vcmask 908288   ;;  %vm443_vm8 = vcmask 1043456   ;;  %s632_s27 = sshll.u32 %s252_s7, 4  ;;  %s1234_s27 = int_to_ptr.vmem [resolvable:$true] %s632_s27 }
  0x62   : > { %v279_v19 = vmul.f32 %v275_v17, %v1194_v7  ;;  %v304_v26 = vmul.f32 %v300_v22, %v1194_v7  ;;  %vm439_vm9 = vcmask 293888   ;;  %vm524_vm10 = vcmask 31744  }
  0x63   : > { %v278_v23 = vmul.f32 %v274_v21, %v1192_v6  ;;  %v303_v30 = vmul.f32 %v299_v27, %v1192_v6  ;;  %v606_v36 = vrot.slane %v1194_v7, 4 }
  0x64   : > { %312 = vrot.lane.b32.xlu0 %v279_v19, %s995_s23  ;;  %v355_v28 = vcombine.low %v279_v19, %v279_v19  ;;  %v387_v33 = vcombine.high %v279_v19, %v279_v19  ;;  %v373_v34 = vcombine.low %v304_v26, %v304_v26  ;;  %v414_v35 = vcombine.high %v304_v26, %v304_v26 }
  0x65   : > { %345 = vrot.lane.b32.xlu1 %v304_v26, %s997_s13  ;;  %v307_v29 = vcombine.high %v278_v23, %v278_v23  ;;  %v354_v31 = vcombine.low %v278_v23, %v278_v23  ;;  %v340_v32 = vcombine.high %v303_v30, %v303_v30 }
  0x68   : > { %358 = vrot.lane.b32.xlu0 %v278_v23, %s996_s25 }
  0x69   : > { %360 = vrot.lane.b32.xlu1 %v355_v28, %s996_s25  ;;  %v428_v28 = vld [vmem:[%s1283_s2] sm:$0xf] }
  0x6c   : > { %308 = vrot.lane.b32.xlu0 %v278_v23, %s995_s23 }
  0x6d   : > { %356 = vrot.lane.b32.xlu1 %v354_v31, %s996_s25 }
  0x70   : > { %310 = vrot.lane.b32.xlu0 %v307_v29, %s995_s23 }
  0x71   : > { %378 = vrot.lane.b32.xlu1 %v304_v26, %s998_s14 }
  0x74   : > { %343 = vrot.lane.b32.xlu0 %v340_v32, %s997_s13 }
  0x75   : > { %392 = vrot.lane.b32.xlu1 %v387_v33, %s999_s21 }
  0x78   : > { %341 = vrot.lane.b32.xlu0 %v303_v30, %s997_s13  ;;  %s1232_s13 = scalar_lea.hbm %s1285_s4, %s752_s29 }
  0x79   : > { %405 = vrot.lane.b32.xlu1 %v1194_v7, %s1000_s6 }
  0x7c   : > { %376 = vrot.lane.b32.xlu0 %v373_v34, %s998_s14  ;;  %v523_v34 = vld [vmem:[%s1284_s3] sm:$0xf] }
  0x7d   : > { %388 = vrot.lane.b32.xlu1 %v307_v29, %s999_s21 }
  0x80   : > { %390 = vrot.lane.b32.xlu0 %v279_v19, %s999_s21  ;;  %s904_s21 = scalar_lea.vmem %s1234_s27, 128 }
  0x81   : > { %417 = vrot.lane.b32.xlu1 %v304_v26, %s1001_s11  ;;  %p905_p11 = scmp.ne.s32.totalorder %s1234_s27, %s904_s21 }
  0x83   : > { %p906_p6 = pnand %p905_p11, %p1130_p13 }
  0x84   : > { %403 = vrot.lane.b32.xlu0 %v324_v10, %s1000_s6 }
  0x85   : > { %415 = vrot.lane.b32.xlu1 %v340_v32, %s1001_s11  ;;  %p907_p8 = pneg %p906_p6 }
  0x88   : > { %374 = vrot.lane.b32.xlu0 %v303_v30, %s998_s14  ;;  %s616_s14 = scalar_lea.sflag [#allocation5], %s1180_s22 }
  0x8c   : > { %401 = vrot.lane.b32.xlu0 %v1192_v6, %s1000_s6  ;;  %s908_s6 = sshll.u32 %s1003_s18, 4  ;;  %s909_s6 = int_to_ptr.vmem [resolvable:$false] %s908_s6 }
  0x8d   : > { %p911_p9 = scmp.lt.s32.totalorder %s1234_s27, %s909_s6 }
  0x90   : > { %419 = vrot.lane.b32.xlu0 %v414_v35, %s1001_s11  ;;  %v605_v35 = vrot.slane %v1192_v6, 4  ;;  %s910_s11 = scalar_lea.vmem %s909_s6, 256 }
  0x91   : > { %p912_p12 = scmp.lt.s32.totalorder %s910_s11, %s904_s21 }
  0x93   : > { %p913_p0 = por %p912_p12, %p911_p9 }
  0x95   : > { %p914_p5 = pnand %p913_p0, %p907_p8 }
  0xcb   : > { %v328_v37 = vpop.permute.xlu1 %327 }
  0xcf   : > { %v330_v38 = vpop.permute.xlu1 %329 }
  0xd0   : > { %v333_v39 = vsel %vm331_vm0, %v328_v37, %v330_v38 }
  0xd1   : > { %337 = vst [vmem:[#allocation2 + $0x8] sm:$0xf0] %v333_v39  ;;  %v607_v39 = vsel %vm443_vm8, %v605_v35, %v606_v36 }
  0xd3   : > { %v326_v41 = vpop.permute.xlu1 %325 }
  0xd4   : > { %v332_v42 = vsel %vm331_vm0, %v326_v41, %v328_v37 }
  0xd5   : > { %336 = vst [vmem:[#allocation2] sm:$0xf0] %v332_v42 }
  0xd6   : > { %v313_v40 = vpop.permute.xlu0 %312 }
  0xd7   : > { %v346_v44 = vpop.permute.xlu1 %345 }
  0xda   : > { %v359_v43 = vpop.permute.xlu0 %358 }
  0xdb   : > { %v361_v46 = vpop.permute.xlu1 %360 }
  0xdc   : > { %v364_v47 = vsel %vm362_vm1, %v359_v43, %v361_v46 }
  0xdd   : > { %368 = vst [vmem:[#allocation2 + $0x18] sm:$0xf0] %v364_v47 }
  0xde   : > { %v309_v45 = vpop.permute.xlu0 %308 }
  0xdf   : > { %v357_v51 = vpop.permute.xlu1 %356 }
  0xe0   : > { %v363_v52 = vsel %vm362_vm1, %v357_v51, %v359_v43 }
  0xe1   : > { %367 = vst [vmem:[#allocation2 + $0x10] sm:$0xf0] %v363_v52 }
  0xe2   : > { %v311_v48 = vpop.permute.xlu0 %310 }
  0xe3   : > { %v315_v49 = vsel %vm314_vm2, %v309_v45, %v311_v48  ;;  %v316_v50 = vsel %vm314_vm2, %v311_v48, %v313_v40  ;;  %v379_v55 = vpop.permute.xlu1 %378 }
  0xe4   : > { %319 = vst [vmem:[#allocation2] sm:$0xf] %v315_v49  ;;  %320 = vst [vmem:[#allocation2 + $0x8] sm:$0xf] %v316_v50 }
  0xe6   : > { %v344_v53 = vpop.permute.xlu0 %343 }
  0xe7   : > { %v349_v54 = vsel %vm347_vm3, %v344_v53, %v346_v44  ;;  %v393_v58 = vpop.permute.xlu1 %392 }
  0xe8   : > { %353 = vst [vmem:[#allocation2 + $0x18] sm:$0xf] %v349_v54 }
  0xea   : > { %v342_v56 = vpop.permute.xlu0 %341 }
  0xeb   : > { %v348_v57 = vsel %vm347_vm3, %v342_v56, %v344_v53  ;;  %v430_v61 = vld [vmem:[#allocation2 + $0x8] sm:$0xff]  ;;  %v406_v63 = vpop.permute.xlu1 %405  ;;  %v429_v3 = vld [vmem:[#allocation2] sm:$0xff] }
  0xec   : > { %352 = vst [vmem:[#allocation2 + $0x10] sm:$0xf] %v348_v57 }
  0xee   : > { %v377_v59 = vpop.permute.xlu0 %376 }
  0xef   : > { %v382_v60 = vsel %vm380_vm4, %v377_v59, %v379_v55  ;;  %v432_v62 = vld [vmem:[#allocation2 + $0x18] sm:$0xff]  ;;  %v389_v5 = vpop.permute.xlu1 %388 }
  0xf0   : > { %386 = vst [vmem:[#allocation2 + $0x28] sm:$0xf0] %v382_v60  ;;  %v753_v0 = vpack.c.bf16 %v432_v62, %v430_v61 }
  0xf2   : > { %754 = vmatprep.subr.bf16.mxu0 %v753_v0  ;;  %v391_v1 = vpop.permute.xlu0 %390 }
  0xf3   : > { %v396_v2 = vsel %vm394_vm5, %v391_v1, %v393_v58  ;;  %v431_v4 = vld [vmem:[#allocation2 + $0x10] sm:$0xff]  ;;  %v395_v9 = vsel %vm394_vm5, %v389_v5, %v391_v1  ;;  %v418_v12 = vpop.permute.xlu1 %417 }
  0xf4   : > { %400 = vst [vmem:[#allocation2 + $0x38] sm:$0xf] %v396_v2  ;;  %v755_v8 = vpack.c.bf16 %v431_v4, %v429_v3  ;;  %399 = vst [vmem:[#allocation2 + $0x30] sm:$0xf] %v395_v9 }
  0xf6   : > { %756 = vmatpush1.bf16.msra.mxu0 %v755_v8  ;;  %v404_v10 = vpop.permute.xlu0 %403 }
  0xf7   : > { %v409_v11 = vsel %vm407_vm6, %v404_v10, %v406_v63  ;;  %v416_v15 = vpop.permute.xlu1 %415  ;;  %v434_v19 = vld [vmem:[#allocation2 + $0x28] sm:$0xff] }
  0xf8   : > { %413 = vst [vmem:[#allocation2 + $0x38] sm:$0xf0] %v409_v11  ;;  %v422_v16 = vsel %vm421_vm7, %v416_v15, %v418_v12 }
  0xf9   : > { %426 = vst [vmem:[#allocation2 + $0x40] sm:$0xf] %v422_v16 }
  0xfa   : > { %v375_v13 = vpop.permute.xlu0 %374 }
  0xfb   : > { %v381_v14 = vsel %vm380_vm4, %v375_v13, %v377_v59 }
  0xfc   : > { %385 = vst [vmem:[#allocation2 + $0x20] sm:$0xf0] %v381_v14 }
  0xfe   : > { %v402_v17 = vpop.permute.xlu0 %401 }
  0xff   : > { %v408_v18 = vsel %vm407_vm6, %v402_v17, %v404_v10  ;;  %v436_v20 = vld [vmem:[#allocation2 + $0x38] sm:$0xff] }
 0x100   : > { %412 = vst [vmem:[#allocation2 + $0x30] sm:$0xf0] %v408_v18  ;;  %v757_v21 = vpack.c.bf16 %v436_v20, %v434_v19  ;;  %v437_v29 = vld [vmem:[#allocation2 + $0x40] sm:$0xf] }
 0x102   : > { %758 = vmatprep.subr.bf16.mxu0 %v757_v21  ;;  %v420_v22 = vpop.permute.xlu0 %419 }
 0x103   : > { %v423_v23 = vsel %vm421_vm7, %v418_v12, %v420_v22  ;;  %v433_v24 = vld [vmem:[#allocation2 + $0x20] sm:$0xff] }
 0x104   : > { %427 = vst [vmem:[#allocation2 + $0x48] sm:$0xf] %v423_v23 }
 0x107   : > { %v435_v25 = vld [vmem:[#allocation2 + $0x30] sm:$0xff] }
 0x108   : > { %v759_v26 = vpack.c.bf16 %v435_v25, %v433_v24 }
 0x10a   : > { %760 = vmatpush1.bf16.msra.mxu0 %v759_v26 }
 0x10b   : > { %v438_v27 = vld [vmem:[#allocation2 + $0x48] sm:$0xf] }
 0x10c   : > { %740 = vmatprep.subr.msk.mxu0 %vm443_vm8, %v438_v27 }
 0x10e   : > { %741 = vmatpush1.msk.msra.mxu0 %vm443_vm8, %v437_v29 }
 0x10f   : > { %742 = vmatmul.mubr.msk.f32.vlgmr.msra.gmra.mrb[0].mxu0 %vm439_vm9, %v428_v28 }
 0x1e2   : > { %v516_v30 = vpop.f32.mrb[0].mxu0 }
 0x1e3   : > { %v518_v31 = vpop.f32.mrb[1].mxu0  ;;  %v521_v33 = vmax.f32 %v516_v30, 0.0 }
 0x1e4   : > { %v522_v32 = vmax.f32 %v518_v31, 0.0 }
 0x1e6   : > { %743 = vmatprep.subr.msk.mxu1 %vm443_vm8, %v522_v32 }
 0x1e7   : > { %744 = vmatpush1.msk.msra.mxu1 %vm443_vm8, %v521_v33 }
 0x1e8   : > { %745 = vmatmul.mubr.msk.f32.vlgmr.msra.gmra.mrb[0].mxu1 %vm524_vm10, %v523_v34 }
 0x2bb   : > { %v600_v37 = vpop.f32.mrb[0].mxu1 }
 0x2bc   : > { %v602_v38 = vpop.f32.mrb[1].mxu1 }
 0x2bd   : > { %v611_v40 = vcombine.low %v600_v37, %v602_v38 }
 0x2bf   : > { %v613_v41 = vadd.f32 %v611_v40, %v607_v39 }
 0x2c1   : > { %614 = vst [vmem:[%s252_s7] sm:$0xff] %v613_v41 }
 0x2c2   : > { %917 = shalt.err (!%p914_p5)
}
 0x2c3   : > { %s918_s22 = scalar_lea.hbm %s1232_s13, 128  ;;  %s922_s24 = scalar_lea.hbm %s1285_s4, 256 }
 0x2c4   : > { %p919_p10 = scmp.ne.s32.totalorder %s1232_s13, %s918_s22  ;;  %p923_p7 = scmp.lt.u32.totalorder %s1232_s13, %s1285_s4 }
 0x2c5   : > { %p924_p3 = scmp.lt.u32.totalorder %s922_s24, %s918_s22  ;;  %p926_p11 = scmp.lt.u32.totalorder %s918_s22, %s1232_s13 }
 0x2c6   : > { %p920_p4 = pnand %p919_p10, %p1130_p13 }
 0x2c7   : > { %p925_p2 = por %p924_p3, %p923_p7 }
 0x2c8   : > { %p921_p1 = pneg %p920_p4 }
 0x2c9   : > { %p927_p6 = por %p926_p11, %p925_p2 }
 0x2cb   : > { %p928_p8 = pnand %p927_p6, %p921_p1 }
 0x2cd   : > { %931 = shalt.err (!%p928_p8)
}
 0x2ce   : > { %767 = dma.vmem_to_hbm [thread:$0]  (%p1130_p13), %s1234_s27, 128, %s1232_s13, %s616_s14  }
 0x2cf PF: > { %s644_s29 = sand.u32 1, %s970_s15   ;;  %p1304_p9 = scmp.ne.s32.totalorder %s1293_s26, 0 }
 0x2d0   : > { %p1305_p12 = scmp.ge.s32.totalorder %s990_s20, 2  ;;  %s645_s7 = scalar_lea.sflag [#allocation5], %s644_s29 }
 0x2d2   : > { %p778_p0 = pnand %p1305_p12, %p1304_p9 }
 0x2d4   : > { %965 = dma.done.wait (!%p778_p0), %s645_s7, 128  }
 0x2d5   : > { %967 = vsyncadd (!%p778_p0), %s645_s7, 4294967168  ;;  %s21_s20 = sadd.s32 1, %s990_s20   ;;  %s1306_s15 = smov %s974_s16 }
 0x2d6   : > { %p18_p5 = scmp.ge.s32.totalorder %s21_s20, 4   ;;  %s1307_s16 = smov %s978_s17 }
 0x2d7   : > { %s1308_s17 = smov %s1138_s10  ;;  %s1309_s18 = smov %s986_s19 }
 0x2d8   : > { %s1310_s19 = smov %s1312_s5  ;;  %20 = sbr.rel (!%p18_p5) target bundleno = 7 (0x7), region = 87 }
 0x2df   :  { %650 = vsyncpa [#allocation4], 1 }
 0x2e0   :  { %652 = vsyncpa [#allocation4 + $0x1], 1 }
 0x2e1   :  { %653 = vsyncpa [#allocation7], 1 }
 0x2e2   :  { %654 = vsyncpa [#allocation5], 1 }
 0x2e3   :  { %656 = vsyncpa [#allocation5 + $0x1], 1 }

</bundles_post_ra>
